<compile_context>
chip_gen: v6e
topology: v6e:2x2x1
jax: 0.10.0
libtpu: 0.0.40
codegen_flags: <defaults>
</compile_context>

<pallas_src>
import jax
import jax.numpy as jnp
from jax import lax
from jax.experimental import pallas as pl
from jax.experimental.pallas import tpu as pltpu


_MAX_BLOCK_BATCH = 8192
_VMEM_TILE_BUDGET = 40 << 20   # bytes reserved for tiles + intermediates (cross-generation safe)


def _final_classification_kernel(x_ref, w1_ref, b1_ref, w2_ref, b2_ref, o_ref):
    # x_ref : (TB, D)     VMEM  (pipelined batch tile)
    # w1_ref: (D, 128)    VMEM  (resident: constant block index across the grid)
    # b1_ref: (1, 128)    VMEM
    # w2_ref: (1, 128)    VMEM  (fc2 weight as a row)
    # b2_ref: (1, 1)      SMEM  (scalar)
    # o_ref : (1, 1, TB)  VMEM  (lane-dense: batch mapped to the 128-lane axis)

    # fc1: (TB, D) @ (D, 128) on the MXU, f32 accumulation.
    h = jnp.dot(x_ref[...], w1_ref[...], preferred_element_type=jnp.float32)
    h = h + b1_ref[...].astype(jnp.float32)

    # LeakyReLU (PyTorch default negative_slope = 0.01).
    h = jnp.where(h > 0, h, 0.01 * h)

    # Dropout(p=0.5): identity in eval mode.

    # fc2 as a skinny MXU contraction landing directly in the lane-dense (1, TB) layout:
    # (1, 128) . (TB, 128) contracted over the hidden axis -> (1, TB). No transpose needed.
    logits = lax.dot_general(
        w2_ref[...].astype(jnp.float32), h,
        dimension_numbers=(((1,), (1,)), ((), ())),
        preferred_element_type=jnp.float32,
    )
    logits = logits + b2_ref[0, 0]

    # Numerically stable sigmoid via tanh (single EUP op).
    probs = 0.5 * (1.0 + jnp.tanh(0.5 * logits))
    o_ref[...] = probs.reshape(o_ref.shape).astype(o_ref.dtype)


def _choose_block_batch(B, D, H, x_itemsize):
    """Largest 128-multiple batch tile that fits the VMEM budget; >= 2 tiles when possible."""
    d_pad = ((D + 127) // 128) * 128
    # Per-batch-row VMEM cost: double-buffered x tile row + f32 hidden row + output rows.
    per_row = 2 * d_pad * x_itemsize + H * 4 + 2 * 4
    # Resident weights (w1, b1, w2), conservatively f32 and double-buffered.
    weight_bytes = 2 * (d_pad * H * 4 + 4 * H * 4)
    avail = max(_VMEM_TILE_BUDGET - weight_bytes, 128 * per_row)
    tb = min(_MAX_BLOCK_BATCH, avail // per_row)
    tb = max(128, (tb // 128) * 128)
    if B > 128:
        # Keep at least two tiles so the parallel batch axis shards across both v7x TCs.
        half = ((-(-B // 2)) + 127) // 128 * 128
        tb = min(tb, half)
    return int(max(128, tb))


def final_classification(x, w1, b1, w2, b2, *, block_batch=None, use_bf16=False):
    """fc1 -> leaky_relu -> dropout(eval) -> fc2 -> sigmoid.

    x: (B, D); w1: (D, 128); b1: (128,); w2: (128, 1); b2: (1,).  Returns (B, 1) float32.
    If use_bf16, x and w1 are cast to bfloat16 (halves the dominant HBM traffic; f32 accumulation).
    """
    B, D = x.shape
    H = w1.shape[1]
    assert w1.shape == (D, H) and b1.shape == (H,)
    assert w2.shape == (H, 1) and b2.shape == (1,)

    if use_bf16:
        x = x.astype(jnp.bfloat16)
        w1 = w1.astype(jnp.bfloat16)

    x_itemsize = jnp.dtype(x.dtype).itemsize
    w_itemsize = jnp.dtype(w1.dtype).itemsize

    TB = block_batch if block_batch is not None else _choose_block_batch(B, D, H, x_itemsize)
    assert TB % 128 == 0, TB

    # Pad the batch to a multiple of TB; padded rows are computed (cheap) and sliced off.
    n_tiles = pl.cdiv(B, TB)
    Bp = n_tiles * TB
    if Bp != B:
        x = jnp.pad(x, ((0, Bp - B), (0, 0)))

    b1_2d = b1.reshape(1, H).astype(jnp.float32)
    w2_row = w2.reshape(1, H).astype(jnp.float32)   # fc2 weight as a row (hidden on lanes)
    b2_2d = b2.reshape(1, 1).astype(jnp.float32)

    # Explicit VMEM limit sized from the actual tile usage (plus headroom), so large TB/D
    # combinations don't trip the scoped default on any generation.
    d_pad = ((D + 127) // 128) * 128
    tile_vmem = (2 * TB * d_pad * x_itemsize      # double-buffered x tile
                 + 2 * d_pad * H * w_itemsize     # w1 (default double-buffered)
                 + TB * H * 4                     # f32 hidden intermediate
                 + 2 * TB * 4                     # double-buffered output tile
                 + (4 << 20))                     # headroom
    vmem_limit = int(min(max(tile_vmem, 24 << 20), 56 << 20))

    out = pl.pallas_call(
        _final_classification_kernel,
        out_shape=jax.ShapeDtypeStruct((n_tiles, 1, TB), jnp.float32),
        grid=(n_tiles,),
        in_specs=[
            pl.BlockSpec((TB, D), lambda i: (i, 0)),      # x: streamed batch tiles
            pl.BlockSpec((D, H), lambda i: (0, 0)),       # w1: VMEM-resident
            pl.BlockSpec((1, H), lambda i: (0, 0)),       # b1
            pl.BlockSpec((1, H), lambda i: (0, 0)),       # w2 (row)
            pl.BlockSpec(memory_space=pltpu.MemorySpace.SMEM),   # b2 scalar in SMEM
        ],
        out_specs=pl.BlockSpec((1, 1, TB), lambda i: (i, 0, 0)),  # lane-dense, rule-clean block
        compiler_params=pltpu.CompilerParams(
            dimension_semantics=("parallel",),   # independent batch tiles -> both v7x TCs
            vmem_limit_bytes=vmem_limit,
        ),
    )(x, w1, b1_2d, w2_row, b2_2d)

    # (n_tiles, 1, TB) row-major == padded batch order; back to a (B, 1) column.
    return out.reshape(Bp, 1)[:B]


def _reference(x, w1, b1, w2, b2):
    h = x @ w1 + b1
    h = jnp.where(h > 0, h, 0.01 * h)
    return jax.nn.sigmoid(h @ w2 + b2)


if __name__ == "__main__":
    key = jax.random.PRNGKey(0)
    # Batch deliberately NOT a multiple of 128 (exercises padding) and > 128 (exercises 2 tiles).
    B, D, H = 200, 64, 128

    k_x, k_w1, k_b1, k_w2, k_b2 = jax.random.split(key, 5)
    x = jax.random.normal(k_x, (B, D), dtype=jnp.float32)

    # Deterministic parameter init (mimicking nn.Linear's uniform(-1/sqrt(fan_in), 1/sqrt(fan_in))).
    lim1 = 1.0 / jnp.sqrt(jnp.float32(D))
    lim2 = 1.0 / jnp.sqrt(jnp.float32(H))
    w1 = jax.random.uniform(k_w1, (D, H), minval=-lim1, maxval=lim1, dtype=jnp.float32)
    b1 = jax.random.uniform(k_b1, (H,), minval=-lim1, maxval=lim1, dtype=jnp.float32)
    w2 = jax.random.uniform(k_w2, (H, 1), minval=-lim2, maxval=lim2, dtype=jnp.float32)
    b2 = jax.random.uniform(k_b2, (1,), minval=-lim2, maxval=lim2, dtype=jnp.float32)

    ref = _reference(x, w1, b1, w2, b2)

    # f32 path (exact sigmoid via tanh, f32 MXU accumulation) -> tight tolerance.
    out = jax.block_until_ready(final_classification(x, w1, b1, w2, b2))
    assert out.shape == (B, 1), out.shape
    err_f32 = float(jnp.max(jnp.abs(out - ref)))
    assert err_f32 < 1e-4, err_f32

    # bf16 fast path (halved x-stream HBM traffic) -> looser tolerance.
    out_bf16 = jax.block_until_ready(final_classification(x, w1, b1, w2, b2, use_bf16=True))
    err_bf16 = float(jnp.max(jnp.abs(out_bf16 - ref)))
    assert err_bf16 < 3e-2, err_bf16

    print("KERNEL_OK")
</pallas_src>

<mosaic_0001>
module attributes {stable_mosaic.version = 11 : i64} {
  func.func @_final_classification_kernel(%arg0: i32, %arg1: memref<128x64xf32, #tpu.memory_space<vmem>>, %arg2: memref<64x128xf32, #tpu.memory_space<vmem>>, %arg3: memref<1x128xf32, #tpu.memory_space<vmem>>, %arg4: memref<1x128xf32, #tpu.memory_space<vmem>>, %arg5: memref<1x1xf32, #tpu.memory_space<smem>>, %arg6: memref<1x1x128xf32, #tpu.memory_space<vmem>>) attributes {dimension_semantics = [#tpu.dimension_semantics<parallel>], iteration_bounds = array<i64: 2>, scalar_prefetch = 0 : i64, scratch_operands = 0 : i64, tpu.core_type = #tpu.core_type<tc>, window_params = [{transform_indices = @transform_0, window_bounds = array<i64: 128, 64>}, {pipeline_mode = #tpu.pipeline_mode<synchronous>, transform_indices = @transform_1, window_bounds = array<i64: 64, 128>}, {pipeline_mode = #tpu.pipeline_mode<synchronous>, transform_indices = @transform_2, window_bounds = array<i64: 1, 128>}, {pipeline_mode = #tpu.pipeline_mode<synchronous>, transform_indices = @transform_3, window_bounds = array<i64: 1, 128>}, {transform_indices = @transform_4, window_bounds = array<i64: 1, 1>}, {transform_indices = @transform_5, window_bounds = array<i64: 1, 1, 128>}]} {
    %c0 = arith.constant 0 : index
    %c0_0 = arith.constant 0 : index
    %0 = vector.load %arg1[%c0, %c0_0] : memref<128x64xf32, #tpu.memory_space<vmem>>, vector<128x64xf32>
    %c0_1 = arith.constant 0 : index
    %c0_2 = arith.constant 0 : index
    %1 = vector.load %arg2[%c0_1, %c0_2] : memref<64x128xf32, #tpu.memory_space<vmem>>, vector<64x128xf32>
    %cst = arith.constant dense<0.000000e+00> : vector<128x128xf32>
    %2 = tpu.matmul %0, %1, %cst {dimension_numbers = #tpu.dot_dimension_numbers<[1], [0], [0], [1], [0, 0, 1, 1], [], []>} : vector<128x64xf32>, vector<64x128xf32>, vector<128x128xf32> -> vector<128x128xf32>
    %c0_3 = arith.constant 0 : index
    %c0_4 = arith.constant 0 : index
    %3 = vector.load %arg3[%c0_3, %c0_4] : memref<1x128xf32, #tpu.memory_space<vmem>>, vector<1x128xf32>
    %4 = vector.broadcast %3 : vector<1x128xf32> to vector<128x128xf32>
    %5 = arith.addf %2, %4 : vector<128x128xf32>
    %cst_5 = arith.constant 0.000000e+00 : f32
    %6 = vector.broadcast %cst_5 : f32 to vector<128x128xf32>
    %7 = arith.cmpf ogt, %5, %6 : vector<128x128xf32>
    %cst_6 = arith.constant 0.00999999977 : f32
    %8 = vector.broadcast %cst_6 : f32 to vector<128x128xf32>
    %9 = arith.mulf %8, %5 : vector<128x128xf32>
    %10 = arith.select %7, %5, %9 : vector<128x128xi1>, vector<128x128xf32>
    %c0_7 = arith.constant 0 : index
    %c0_8 = arith.constant 0 : index
    %11 = vector.load %arg4[%c0_7, %c0_8] : memref<1x128xf32, #tpu.memory_space<vmem>>, vector<1x128xf32>
    %cst_9 = arith.constant dense<0.000000e+00> : vector<1x128xf32>
    %12 = tpu.matmul %11, %10, %cst_9 {dimension_numbers = #tpu.dot_dimension_numbers<[1], [1], [0], [0], [0, 0, 1, 0], [], []>} : vector<1x128xf32>, vector<128x128xf32>, vector<1x128xf32> -> vector<1x128xf32>
    %c0_10 = arith.constant 0 : index
    %c0_11 = arith.constant 0 : index
    %13 = memref.load %arg5[%c0_10, %c0_11] : memref<1x1xf32, #tpu.memory_space<smem>>
    %14 = vector.broadcast %13 : f32 to vector<1x128xf32>
    %15 = arith.addf %12, %14 : vector<1x128xf32>
    %cst_12 = arith.constant 5.000000e-01 : f32
    %16 = vector.broadcast %cst_12 : f32 to vector<1x128xf32>
    %17 = arith.mulf %16, %15 : vector<1x128xf32>
    %18 = math.tanh %17 : vector<1x128xf32>
    %cst_13 = arith.constant 1.000000e+00 : f32
    %19 = vector.broadcast %cst_13 : f32 to vector<1x128xf32>
    %20 = arith.addf %19, %18 : vector<1x128xf32>
    %cst_14 = arith.constant 5.000000e-01 : f32
    %21 = vector.broadcast %cst_14 : f32 to vector<1x128xf32>
    %22 = arith.mulf %21, %20 : vector<1x128xf32>
    %23 = vector.shape_cast %22 : vector<1x128xf32> to vector<1x1x128xf32>
    %c0_15 = arith.constant 0 : index
    %c0_16 = arith.constant 0 : index
    %c0_17 = arith.constant 0 : index
    %24 = vector.load %arg6[%c0_15, %c0_16, %c0_17] : memref<1x1x128xf32, #tpu.memory_space<vmem>>, vector<1x1x128xf32>
    tpu.vector_store %arg6[%c0_15, %c0_16, %c0_17], %23 {strides = array<i32>} : memref<1x1x128xf32, #tpu.memory_space<vmem>>, vector<1x1x128xf32>,
    return
  }
  func.func @transform_0(%arg0: i32) -> (i32, i32) {
    %c0_i32 = arith.constant 0 : i32
    %c0_i32_0 = arith.constant 0 : i32
    return %arg0, %c0_i32 : i32, i32
  }
  func.func @transform_1(%arg0: i32) -> (i32, i32) {
    %c0_i32 = arith.constant 0 : i32
    %c0_i32_0 = arith.constant 0 : i32
    %c0_i32_1 = arith.constant 0 : i32
    return %c0_i32, %c0_i32_0 : i32, i32
  }
  func.func @transform_2(%arg0: i32) -> (i32, i32) {
    %c0_i32 = arith.constant 0 : i32
    %c0_i32_0 = arith.constant 0 : i32
    %c0_i32_1 = arith.constant 0 : i32
    return %c0_i32, %c0_i32_0 : i32, i32
  }
  func.func @transform_3(%arg0: i32) -> (i32, i32) {
    %c0_i32 = arith.constant 0 : i32
    %c0_i32_0 = arith.constant 0 : i32
    %c0_i32_1 = arith.constant 0 : i32
    return %c0_i32, %c0_i32_0 : i32, i32
  }
  func.func @transform_4(%arg0: i32) -> (i32, i32) {
    %c0_i32 = arith.constant 0 : i32
    %c0_i32_0 = arith.constant 0 : i32
    %c0_i32_1 = arith.constant 0 : i32
    return %c0_i32, %c0_i32_0 : i32, i32
  }
  func.func @transform_5(%arg0: i32) -> (i32, i32, i32) {
    %c0_i32 = arith.constant 0 : i32
    %c0_i32_0 = arith.constant 0 : i32
    %c0_i32_1 = arith.constant 0 : i32
    return %arg0, %c0_i32, %c0_i32_0 : i32, i32, i32
  }
}

</mosaic_0001>

<bundles_post_ra>
// kernel: tpu_custom_call.1
= control target key start
LH: loop header
LB: loop body
LE: loop exit
PB: predicated region body
PF: predicated region fallthrough
CT: control target
= control target key end

     0   :  { %s1130_s0 = inlined_call_operand.vmem [shape: f32[256,64], index: 0, kind: input, shape index: {}]   ;;  %s1131_s1 = inlined_call_operand.vmem [shape: f32[64,128], index: 1, kind: input, shape index: {}]   ;;  %s1132_s2 = inlined_call_operand.vmem [shape: f32[1,128], index: 2, kind: input, shape index: {}]   ;;  %s1133_s3 = inlined_call_operand.vmem [shape: f32[1,128], index: 3, kind: input, shape index: {}]   ;;  %s1134_s4 = inlined_call_operand.<no memory space> [shape: f32[1,1], index: 4, kind: input, shape index: {}]   ;;  %s1135_s5 = inlined_call_operand.hbm [shape: f32[2,1,128], index: 5, kind: output, shape index: {}]  }
   0x1   :  { %10 = sst [smem:[#allocation2]] %s1134_s4 }
   0x2   :  { %11 = vsyncpa [#allocation4], 0 }
   0x3   :  { %13 = vsyncpa [#allocation4 + $0x1], 0  ;;  %s927_s20 = smov 0   ;;  %s929_s21 = smov 0  }
   0x4   :  { %s931_s22 = smov 0   ;;  %s933_s23 = smov 0  }
   0x5 LB: > { %s643_s4 = sadd.s32 4294967295, %s889_s23   ;;  %s644_s24 = sadd.s32 4294967294, %s889_s23   ;;  %s889_s23 = sphi %s933_s23, %s1141_s23   ;;  %s885_s22 = sphi %s931_s22, %s1140_s22   ;;  %s881_s21 = sphi %s929_s21, %s1139_s21   ;;  %s877_s20 = sphi %s927_s20, %s1138_s20  }
   0x6   : > { %s950_s25 = sadd.s32 1, %s889_s23   ;;  %s136_s26 = sadd.s32 1, %s885_s22 }
   0x7   : > { %s133_s27 = ssub.s32 %s889_s23, %s950_s25  ;;  %p146_p0 = scmp.ne.s32.totalorder %s885_s22, %s881_s21 }
   0x8   : > { %p134_p1 = scmp.eq.s32.totalorder %s133_s27, 0  ;;  %p147_p2 = scmp.eq.s32.totalorder %s643_s4, 1 }
   0x9   : > { %p152_p3 = scmp.ne.s32.totalorder %s881_s21, %s877_s20  ;;  %p153_p4 = scmp.eq.s32.totalorder %s644_s24, 1 }
   0xa   : > { %s960_s28 = scalar_select %p134_p1, %s885_s22, %s136_s26  }
   0xb   : > { %p962_p5 = por %p147_p2, %p146_p0  ;;  %p966_p6 = por %p153_p4, %p152_p3 }
   0xc   : > { %p647_p7 = scmp.ge.s32.totalorder %s889_s23, 1  ;;  %p192_p8 = scmp.lt.s32.totalorder %s889_s23, 3 }
   0xe   : > { %p193_p9 = pnand %p647_p7, %p192_p8 }
   0xf   : > { %s978_s10 = sshll.u32 (!%p193_p9), %s643_s4, 4  ;;  %s499_s15 = sld [smem:[#allocation2]] (!%p193_p9) }
  0x10   : > { %196 = sbr.rel (%p193_p9) target bundleno = 555 (0x22b), region = 40  ;;  %p220_p10 = scmp.lt.s32.totalorder (!%p193_p9), %s978_s10, 31 }
  0x11   : > { %s893_s6 = smov (!%p193_p9), [#allocation3]  }
  0x12   : > { %s833_s7 = sshll.u32 (!%p193_p9), %s893_s6, 4  ;;  %s834_s7 = int_to_ptr.vmem [resolvable:$false] %s833_s7 }
  0x13   : > { %s835_s8 = scalar_lea.vmem (!%p193_p9), %s834_s7, 32 }
  0x15   : > { %v248_v0 = vld [vmem:[%s1131_s1 + $0x38] sm:$0xff]  ;;  %v247_v1 = vld [vmem:[%s1131_s1 + $0x30] sm:$0xff]  ;;  %v246_v2 = vld [vmem:[%s1131_s1 + $0x28] sm:$0xff]  ;;  %s221_s13 = scalar_select %p220_p10, %s978_s10, 31  ;;  %vm256_vm0 = vcmask 523264   ;;  %v891_v24 = vmov 0.0  }
  0x16   : > { %711 = vmatprep.subr.mxu0 %v248_v0  ;;  %v245_v3 = vld [vmem:[%s1131_s1 + $0x20] sm:$0xff]  ;;  %v244_v4 = vld [vmem:[%s1131_s1 + $0x18] sm:$0xff]  ;;  %v243_v6 = vld [vmem:[%s1131_s1 + $0x10] sm:$0xff]  ;;  %751 = vmatprep.subr.mxu1 %v891_v24  ;;  %vm892_vm1 = vmmov 0  }
  0x17   : > { %712 = vmatpush3.msra.mxu0 %v248_v0  ;;  %s649_s16 = sshll.u32 %s221_s13, 3  ;;  %v242_v7 = vld [vmem:[%s1131_s1 + $0x8] sm:$0xff]  ;;  %v241_v8 = vld [vmem:[%s1131_s1] sm:$0xff]  ;;  %783 = vmatprep.mubr.msk.f32.mxu1 %vm892_vm1, %v891_v24 }
  0x18   : > { %713 = vmatprep.subr.mxu0 %v247_v1  ;;  %s994_s24 = scalar_lea.vmem %s1130_s0, %s649_s16  ;;  %v1054_v39 = vld [vmem:[%s1132_s2] ss:$0 sm:$0xff]  ;;  %s217_s16 = sand.u32 1, %s881_s21  }
  0x19   : > { %714 = vmatpush3.msra.mxu0 %v247_v1  ;;  %v225_v5 = vld [vmem:[%s994_s24] sm:$0xff]  ;;  %v226_v9 = vld [vmem:[%s994_s24 + $0x8] sm:$0xff]  ;;  %v227_v10 = vld [vmem:[%s994_s24 + $0x10] sm:$0xff]  ;;  %s218_s17 = scalar_lea.vmem [#allocation3], %s217_s16  ;;  %s577_s26 = scalar_lea.sflag [#allocation4], %s217_s16 }
  0x1a   : > { %715 = vmatprep.subr.mxu0 %v246_v2  ;;  %727 = vmatprep.mubr.msk.f32.mxu0 %vm256_vm0, %v225_v5  ;;  %v228_v11 = vld [vmem:[%s994_s24 + $0x18] sm:$0xff]  ;;  %v229_v12 = vld [vmem:[%s994_s24 + $0x20] sm:$0xff]  ;;  %v230_v13 = vld [vmem:[%s994_s24 + $0x28] sm:$0xff]  ;;  %s589_s18 = sshll.u32 %s218_s17, 4  ;;  %s590_s18 = int_to_ptr.vmem [resolvable:$true] %s589_s18 }
  0x1b   : > { %716 = vmatpush3.msra.mxu0 %v246_v2  ;;  %v231_v14 = vld [vmem:[%s994_s24 + $0x30] sm:$0xff]  ;;  %v232_v15 = vld [vmem:[%s994_s24 + $0x38] sm:$0xff]  ;;  %v233_v16 = vld [vmem:[%s994_s24 + $0x40] sm:$0xff]  ;;  %s829_s27 = scalar_lea.vmem %s590_s18, 16  ;;  %p836_p0 = scmp.lt.s32.totalorder %s590_s18, %s834_s7 }
  0x1c   : > { %717 = vmatprep.subr.mxu0 %v245_v3  ;;  %v234_v17 = vld [vmem:[%s994_s24 + $0x48] sm:$0xff]  ;;  %v235_v18 = vld [vmem:[%s994_s24 + $0x50] sm:$0xff]  ;;  %v236_v19 = vld [vmem:[%s994_s24 + $0x58] sm:$0xff]  ;;  %p830_p11 = scmp.ne.s32.totalorder %s590_s18, %s829_s27  ;;  %p837_p1 = scmp.lt.s32.totalorder %s835_s8, %s829_s27 }
  0x1d   : > { %718 = vmatpush3.msra.mxu0 %v245_v3  ;;  %v237_v20 = vld [vmem:[%s994_s24 + $0x60] sm:$0xff]  ;;  %v238_v21 = vld [vmem:[%s994_s24 + $0x68] sm:$0xff]  ;;  %v239_v22 = vld [vmem:[%s994_s24 + $0x70] sm:$0xff] }
  0x1e   : > { %719 = vmatprep.subr.mxu0 %v244_v4  ;;  %v240_v23 = vld [vmem:[%s994_s24 + $0x78] sm:$0xff]  ;;  %s587_s24 = scalar_lea.hbm %s1135_s5, %s978_s10  ;;  %p831_p12 = pnand %p830_p11, %p962_p5 }
  0x1f   : > { %720 = vmatpush3.msra.mxu0 %v244_v4  ;;  %p838_p2 = por %p837_p1, %p836_p0 }
  0x20   : > { %721 = vmatprep.subr.mxu0 %v243_v6  ;;  %p832_p13 = pneg %p831_p12 }
  0x21   : > { %722 = vmatpush3.msra.mxu0 %v243_v6 }
  0x22   : > { %723 = vmatprep.subr.mxu0 %v242_v7  ;;  %p839_p3 = pnand %p838_p2, %p832_p13 }
  0x23   : > { %724 = vmatpush3.msra.mxu0 %v242_v7 }
  0x24   : > { %725 = vmatprep.subr.mxu0 %v241_v8 }
  0x25   : > { %726 = vmatpush3.msra.mxu0 %v241_v8 }
  0x26   : > { %728 = vmatmul.mubr.msk.f32.vlgmr.msra.gmra.mxu0 %vm256_vm0, %v226_v9 }
  0x27   : > { %730 = vmatprep.mubr.msk.f32.mxu0 %vm256_vm0, %v227_v10 }
  0x2a   : > { %731 = vmatmul.mubr.msk.f32.gmra.mxu0 %vm256_vm0, %v228_v11 }
  0x2b   : > { %733 = vmatprep.mubr.msk.f32.mxu0 %vm256_vm0, %v229_v12 }
  0x2e   : > { %734 = vmatmul.mubr.msk.f32.gmra.mxu0 %vm256_vm0, %v230_v13 }
  0x2f   : > { %736 = vmatprep.mubr.msk.f32.mxu0 %vm256_vm0, %v231_v14 }
  0x32   : > { %737 = vmatmul.mubr.msk.f32.gmra.mxu0 %vm256_vm0, %v232_v15 }
  0x33   : > { %739 = vmatprep.mubr.msk.f32.mxu0 %vm256_vm0, %v233_v16 }
  0x36   : > { %740 = vmatmul.mubr.msk.f32.gmra.mxu0 %vm256_vm0, %v234_v17 }
  0x37   : > { %742 = vmatprep.mubr.msk.f32.mxu0 %vm256_vm0, %v235_v18 }
  0x3a   : > { %743 = vmatmul.mubr.msk.f32.gmra.mxu0 %vm256_vm0, %v236_v19 }
  0x3b   : > { %745 = vmatprep.mubr.msk.f32.mxu0 %vm256_vm0, %v237_v20 }
  0x3e   : > { %746 = vmatmul.mubr.msk.f32.gmra.mxu0 %vm256_vm0, %v238_v21 }
  0x3f   : > { %748 = vmatprep.mubr.msk.f32.mxu0 %vm256_vm0, %v239_v22 }
  0x42   : > { %749 = vmatmul.mubr.msk.f32.gmra.mxu0 %vm256_vm0, %v240_v23 }
  0xe6   : > { %v1039_v25 = vpop.f32.mrf.mxu0 }
  0xe7   : > { %v377_v17 = vadd.f32 %v1039_v25, %v1054_v39 }
  0xe8   : > { %v1041_v26 = vpop.f32.mrf.mxu0 }
  0xe9   : > { %v467_v20 = vmul.f32 0.01, %v377_v17  ;;  %v372_v21 = vadd.f32 %v1054_v39, %v1041_v26  ;;  %vm451_vm0 = vcmp.gt.f32.partialorder %v377_v17, 0.0  ;;  %v500_v26 = vstv %s499_s15 }
  0xea   : > { %v1043_v27 = vpop.f32.mrf.mxu0 }
  0xeb   : > { %v387_v11 = vadd.f32 %v1043_v27, %v1054_v39  ;;  %v466_v23 = vmul.f32 0.01, %v372_v21  ;;  %v483_v27 = vsel %vm451_vm0, %v377_v17, %v467_v20  ;;  %vm450_vm1 = vcmp.gt.f32.partialorder %v372_v21, 0.0 }
  0xec   : > { %v1045_v28 = vpop.f32.mrf.mxu0 }
  0xed   : > { %v469_v14 = vmul.f32 0.01, %v387_v11  ;;  %v382_v15 = vadd.f32 %v1054_v39, %v1045_v28  ;;  %vm453_vm14 = vcmp.gt.f32.partialorder %v387_v11, 0.0  ;;  %v482_v25 = vsel %vm450_vm1, %v372_v21, %v466_v23  ;;  %v498_v28 = vld [vmem:[%s1133_s3] sm:$0x1] }
  0xee   : > { %v1047_v29 = vpop.f32.mrf.mxu0 }
  0xef   : > { %v397_v5 = vadd.f32 %v1047_v29, %v1054_v39  ;;  %v468_v18 = vmul.f32 0.01, %v382_v15  ;;  %v485_v19 = vsel %vm453_vm14, %v387_v11, %v469_v14  ;;  %vm452_vm15 = vcmp.gt.f32.partialorder %v382_v15, 0.0 }
  0xf0   : > { %v1049_v30 = vpop.f32.mrf.mxu0 }
  0xf1   : > { %v471_v8 = vmul.f32 0.01, %v397_v5  ;;  %v392_v9 = vadd.f32 %v1054_v39, %v1049_v30  ;;  %vm455_vm12 = vcmp.gt.f32.partialorder %v397_v5, 0.0  ;;  %v484_v22 = vsel %vm452_vm15, %v382_v15, %v468_v18 }
  0xf2   : > { %v738_v31 = vpop.f32.mrf.mxu0 }
  0xf3   : > { %v407_v63 = vadd.f32 %v738_v31, %v1054_v39  ;;  %v470_v12 = vmul.f32 0.01, %v392_v9  ;;  %v487_v13 = vsel %vm455_vm12, %v397_v5, %v471_v8  ;;  %vm454_vm13 = vcmp.gt.f32.partialorder %v392_v9, 0.0 }
  0xf4   : > { %v401_v32 = vpop.f32.mrf.mxu0 }
  0xf5   : > { %v473_v2 = vmul.f32 0.01, %v407_v63  ;;  %v402_v3 = vadd.f32 %v1054_v39, %v401_v32  ;;  %vm457_vm10 = vcmp.gt.f32.partialorder %v407_v63, 0.0  ;;  %v486_v16 = vsel %vm454_vm13, %v392_v9, %v470_v12 }
  0xf6   : > { %v741_v33 = vpop.f32.mrf.mxu0 }
  0xf7   : > { %v417_v57 = vadd.f32 %v741_v33, %v1054_v39  ;;  %v472_v6 = vmul.f32 0.01, %v402_v3  ;;  %v489_v7 = vsel %vm457_vm10, %v407_v63, %v473_v2  ;;  %vm456_vm11 = vcmp.gt.f32.partialorder %v402_v3, 0.0 }
  0xf8   : > { %v411_v34 = vpop.f32.mrf.mxu0 }
  0xf9   : > { %v475_v60 = vmul.f32 0.01, %v417_v57  ;;  %v412_v61 = vadd.f32 %v1054_v39, %v411_v34  ;;  %vm459_vm8 = vcmp.gt.f32.partialorder %v417_v57, 0.0  ;;  %v488_v10 = vsel %vm456_vm11, %v402_v3, %v472_v6 }
  0xfa   : > { %v744_v35 = vpop.f32.mrf.mxu0 }
  0xfb   : > { %v427_v51 = vadd.f32 %v744_v35, %v1054_v39  ;;  %v474_v0 = vmul.f32 0.01, %v412_v61  ;;  %v491_v1 = vsel %vm459_vm8, %v417_v57, %v475_v60  ;;  %vm458_vm9 = vcmp.gt.f32.partialorder %v412_v61, 0.0 }
  0xfc   : > { %v421_v36 = vpop.f32.mrf.mxu0 }
  0xfd   : > { %v477_v54 = vmul.f32 0.01, %v427_v51  ;;  %v422_v55 = vadd.f32 %v1054_v39, %v421_v36  ;;  %vm461_vm6 = vcmp.gt.f32.partialorder %v427_v51, 0.0  ;;  %v490_v4 = vsel %vm458_vm9, %v412_v61, %v474_v0 }
  0xfe   : > { %v747_v37 = vpop.f32.mrf.mxu0 }
  0xff   : > { %v437_v45 = vadd.f32 %v747_v37, %v1054_v39  ;;  %v476_v58 = vmul.f32 0.01, %v422_v55  ;;  %v493_v59 = vsel %vm461_vm6, %v427_v51, %v477_v54  ;;  %vm460_vm7 = vcmp.gt.f32.partialorder %v422_v55, 0.0 }
 0x100   : > { %v431_v38 = vpop.f32.mrf.mxu0 }
 0x101   : > { %v479_v48 = vmul.f32 0.01, %v437_v45  ;;  %v432_v49 = vadd.f32 %v1054_v39, %v431_v38  ;;  %vm463_vm4 = vcmp.gt.f32.partialorder %v437_v45, 0.0  ;;  %v492_v62 = vsel %vm460_vm7, %v422_v55, %v476_v58 }
 0x102   : > { %v750_v40 = vpop.f32.mrf.mxu0 }
 0x103   : > { %v447_v41 = vadd.f32 %v750_v40, %v1054_v39  ;;  %v478_v52 = vmul.f32 0.01, %v432_v49  ;;  %v495_v53 = vsel %vm463_vm4, %v437_v45, %v479_v48  ;;  %vm462_vm5 = vcmp.gt.f32.partialorder %v432_v49, 0.0 }
 0x104   : > { %v441_v42 = vpop.f32.mrf.mxu0 }
 0x105   : > { %v442_v43 = vadd.f32 %v1054_v39, %v441_v42  ;;  %vm465_vm2 = vcmp.gt.f32.partialorder %v447_v41, 0.0  ;;  %v481_v44 = vmul.f32 0.01, %v447_v41  ;;  %v494_v56 = vsel %vm462_vm5, %v432_v49, %v478_v52 }
 0x107   : > { %v480_v46 = vmul.f32 0.01, %v442_v43  ;;  %v497_v47 = vsel %vm465_vm2, %v447_v41, %v481_v44  ;;  %vm464_vm3 = vcmp.gt.f32.partialorder %v442_v43, 0.0 }
 0x108   : > { %752 = vmatpush3.xpose.msra.mxu1 %v497_v47 }
 0x109   : > { %753 = vmatprep.subr.mxu1 %v891_v24  ;;  %v496_v50 = vsel %vm464_vm3, %v442_v43, %v480_v46 }
 0x10c   : > { %754 = vmatpush3.xpose.msra.mxu1 %v496_v50 }
 0x10d   : > { %755 = vmatprep.subr.mxu1 %v891_v24 }
 0x110   : > { %756 = vmatpush3.xpose.msra.mxu1 %v495_v53 }
 0x111   : > { %757 = vmatprep.subr.mxu1 %v891_v24 }
 0x114   : > { %758 = vmatpush3.xpose.msra.mxu1 %v494_v56 }
 0x115   : > { %759 = vmatprep.subr.mxu1 %v891_v24 }
 0x118   : > { %760 = vmatpush3.xpose.msra.mxu1 %v493_v59 }
 0x119   : > { %761 = vmatprep.subr.mxu1 %v891_v24 }
 0x11c   : > { %762 = vmatpush3.xpose.msra.mxu1 %v492_v62 }
 0x11d   : > { %763 = vmatprep.subr.mxu1 %v891_v24 }
 0x120   : > { %764 = vmatpush3.xpose.msra.mxu1 %v491_v1 }
 0x121   : > { %765 = vmatprep.subr.mxu1 %v891_v24 }
 0x124   : > { %766 = vmatpush3.xpose.msra.mxu1 %v490_v4 }
 0x125   : > { %767 = vmatprep.subr.mxu1 %v891_v24 }
 0x128   : > { %768 = vmatpush3.xpose.msra.mxu1 %v489_v7 }
 0x129   : > { %769 = vmatprep.subr.mxu1 %v891_v24 }
 0x12c   : > { %770 = vmatpush3.xpose.msra.mxu1 %v488_v10 }
 0x12d   : > { %771 = vmatprep.subr.mxu1 %v891_v24 }
 0x130   : > { %772 = vmatpush3.xpose.msra.mxu1 %v487_v13 }
 0x131   : > { %773 = vmatprep.subr.mxu1 %v891_v24 }
 0x134   : > { %774 = vmatpush3.xpose.msra.mxu1 %v486_v16 }
 0x135   : > { %775 = vmatprep.subr.mxu1 %v891_v24 }
 0x138   : > { %776 = vmatpush3.xpose.msra.mxu1 %v485_v19 }
 0x139   : > { %777 = vmatprep.subr.mxu1 %v891_v24 }
 0x13c   : > { %778 = vmatpush3.xpose.msra.mxu1 %v484_v22 }
 0x13d   : > { %779 = vmatprep.subr.mxu1 %v891_v24 }
 0x140   : > { %780 = vmatpush3.xpose.msra.mxu1 %v483_v27 }
 0x141   : > { %781 = vmatprep.subr.mxu1 %v891_v24 }
 0x144   : > { %782 = vmatpush3.xpose.msra.mxu1 %v482_v25 }
 0x147   : > { %784 = vmatmul.mubr.f32.vlgmr.msra.gmra.mxu1 %v498_v28 }
 0x207   : > { %v567_v29 = vpop.f32.mrf.mxu1 }
 0x208   : > { %v568_v30 = vadd.f32 %v567_v29, %v500_v26 }
 0x209   : > { %v785_v31 = vpop.f32.mrf.mxu1 }
 0x20a   : > { %v571_v32 = vmul.f32 0.5, %v568_v30 }
 0x20c   : > { %827 = vtanh.f32 %v571_v32 }
 0x219   : > { %v828_v33 = vpop.eup %827 }
 0x21a   : > { %v573_v24 = vadd.f32 1.0, %v828_v33 }
 0x21c   : > { %v574_v34 = vmul.f32 0.5, %v573_v24 }
 0x21e   : > { %575 = vst [vmem:[%s218_s17] sm:$0x1] %v574_v34 }
 0x21f   : > { %842 = shalt.err (!%p839_p3)
}
 0x220   : > { %s843_s9 = scalar_lea.hbm %s587_s24, 16  ;;  %s847_s12 = scalar_lea.hbm %s1135_s5, 32 }
 0x221   : > { %p844_p4 = scmp.ne.s32.totalorder %s587_s24, %s843_s9  ;;  %p848_p9 = scmp.lt.s32.totalorder %s587_s24, %s1135_s5 }
 0x222   : > { %p849_p10 = scmp.lt.s32.totalorder %s847_s12, %s843_s9 }
 0x223   : > { %p845_p7 = pnand %p844_p4, %p962_p5 }
 0x224   : > { %p850_p11 = por %p849_p10, %p848_p9 }
 0x225   : > { %p846_p8 = pneg %p845_p7 }
 0x227   : > { %p851_p12 = pnand %p850_p11, %p846_p8 }
 0x229   : > { %854 = shalt.err (!%p851_p12)
}
 0x22a   : > { %786 = dma.vmem_to_hbm [thread:$0]  (%p962_p5), %s590_s18, 16, %s587_s24, %s577_s26  }
 0x22b PF: > { %p792_p13 = scmp.ge.s32.totalorder %s889_s23, 2  ;;  %s601_s15 = sand.u32 1, %s877_s20  }
 0x22c   : > { %s602_s16 = scalar_lea.sflag [#allocation4], %s601_s15 }
 0x22d   : > { %p789_p0 = pnand %p792_p13, %p966_p6 }
 0x22f   : > { %p790_p1 = pneg %p789_p0 }
 0x231   : > { %872 = dma.done.wait (%p790_p1), %s602_s16, 16  }
 0x232   : > { %874 = vsyncadd (%p790_p1), %s602_s16, 4294967280  ;;  %p16_p2 = scmp.ge.s32.totalorder %s950_s25, 4   ;;  %s1138_s20 = smov %s881_s21 }
 0x233   : > { %s1139_s21 = smov %s885_s22  ;;  %s1140_s22 = smov %s960_s28 }
 0x234   : > { %s1141_s23 = smov %s950_s25  ;;  %18 = sbr.rel (!%p16_p2) target bundleno = 5 (0x5), region = 75 }
 0x239   :  { %606 = vsyncpa [#allocation4], 1 }
 0x23a   :  { %608 = vsyncpa [#allocation4 + $0x1], 1 }

</bundles_post_ra>
